<compile_context>
chip_gen: v7x
topology: tpu7x:2x2x1
jax: 0.10.0
libtpu: 0.0.40
codegen_flags: <defaults>
</compile_context>

<pallas_src>
import jax
import jax.numpy as jnp
from jax.experimental import pallas as pl
from jax.experimental.pallas import tpu as pltpu


def attention_kernel(enc_ref, w_ref, v_ref, out_ref, scores_ref):
    # enc_ref   : (BB, S, E) block of enc_output (in_dtype)
    # w_ref     : (E, D)     attn weight, pre-transposed (in_dtype)
    # v_ref     : (1, D)     v weight (torch row-vector layout, f32)
    # out_ref   : (BB, E)    sum over sequence of enc * scores (f32)
    # scores_ref: (BB, S, 1) softmax scores (f32)
    enc = enc_ref[...]                                    # (BB, S, E)
    bb, s, e = enc.shape

    # --- energy = tanh(enc @ W^T): one large MXU matmul for the whole block,
    #     f32 accumulation regardless of the input dtype ---
    enc2d = enc.reshape(bb * s, e)                        # merge leading dims (free)
    energy = jnp.tanh(
        jnp.dot(enc2d, w_ref[...], preferred_element_type=jnp.float32)
    )                                                     # (BB*S, D) f32

    # --- attention logits: VPU broadcast-multiply + cross-lane reduce, kept in
    #     the natural (BB, S, 1) layout (no relayout, no (S,S) intermediates) ---
    att = jnp.sum(energy * v_ref[...].astype(jnp.float32),
                  axis=-1, keepdims=True).reshape(bb, s, 1)   # (BB, S, 1)

    # --- softmax over the sequence axis (sublane reductions on the XLU) ---
    m = jnp.max(att, axis=1, keepdims=True)               # (BB, 1, 1)
    p = jnp.exp(att - m)                                  # (BB, S, 1)
    denom = jnp.sum(p, axis=1, keepdims=True)             # (BB, 1, 1)
    # Exact reciprocal keeps 1e-5 parity with the f32 reference.
    scores = p * pl.reciprocal(denom, approx=False)       # (BB, S, 1)
    scores_ref[...] = scores.astype(scores_ref.dtype)

    # --- weighted sum over S: VPU broadcast-multiply + XLU sublane reduce.
    #     (bf16 enc is promoted to f32 by the multiply; no explicit upcast.) ---
    out = jnp.sum(enc * scores, axis=1)                   # (BB, E) f32
    out_ref[...] = out.astype(out_ref.dtype)


def _vmem_capacity_bytes(default=64 * 1024 * 1024):
    """Generation-aware VMEM capacity (v5e/v6e: 128 MiB, v7x: 64 MiB)."""
    try:
        info = pltpu.get_tpu_info()
        cap = getattr(info, "vmem_capacity_bytes", None)
        if cap:
            return int(cap)
    except Exception:
        pass
    return default


def _pick_block_b(batch, seq, enc_dim, att_dim, itemsize, vmem_cap):
    """Batch-block size: fill the MXU M dim, stay inside a generation-aware
    VMEM budget (enc double-buffer + weights + outputs + f32 intermediates),
    keep >=2 grid steps when the batch permits, round DOWN to sublanes."""
    budget = max(4 * 1024 * 1024, int(vmem_cap * 0.45))
    per_row = (
        2 * seq * enc_dim * itemsize   # enc block, double-buffered by the pipeline
        + seq * att_dim * 4            # energy intermediate (f32)
        + seq * enc_dim * 4            # enc*scores product before the sublane reduce (f32)
        + 4 * seq * 4                  # att / exp / scores intermediates (f32)
        + 2 * (enc_dim + seq) * 4      # double-buffered output blocks (f32)
    )
    fixed = 2 * (enc_dim * att_dim + att_dim) * itemsize   # weights (double-buffered)
    bb = max(1, (budget - fixed) // per_row)
    bb = min(bb, max(batch, 1), 1024)
    # Keep at least 2 grid steps when the batch allows it, so v7x's two
    # TensorCores both have work and the enc DMA pipeline can overlap.
    if batch >= 16:
        bb = min(bb, -(-batch // 2))
    # Round DOWN to a multiple of 8 sublanes so the VMEM budget is not exceeded.
    bb = max(8, (bb // 8) * 8)
    return int(bb)


def attention_forward(enc_output, attn_w, v_w, *, block_b=None, input_dtype=None):
    """IMLENet attention forward.

    enc_output: (B, S, E); attn_w: (D, E) torch Linear layout; v_w: (1, D).
    Returns (sum over S of enc*scores) with shape (B, E) and scores (B, S, 1).

    input_dtype: pass jnp.bfloat16 on v5e/v6e/v7x to halve the dominant HBM
    stream (matmul accumulation / tanh / softmax stay f32).  Default keeps the
    input dtype (f32 → 1e-5 parity with the reference).
    """
    B, S, E = enc_output.shape
    D = attn_w.shape[0]
    in_dtype = jnp.dtype(enc_output.dtype if input_dtype is None else input_dtype)
    itemsize = in_dtype.itemsize

    vmem_cap = _vmem_capacity_bytes()
    bb = _pick_block_b(B, S, E, D, itemsize, vmem_cap) if block_b is None else block_b
    bp = -(-B // bb) * bb                         # pad batch to a multiple of bb

    enc_in = enc_output
    if bp != B:
        enc_in = jnp.pad(enc_in, ((0, bp - B), (0, 0), (0, 0)))
    enc_in = enc_in.astype(in_dtype)
    w_t = jnp.asarray(attn_w).T.astype(in_dtype)            # (E, D)
    v_row = jnp.asarray(v_w).reshape(1, D).astype(jnp.float32)

    grid = (bp // bb,)
    vmem_limit = int(min(vmem_cap * 3 // 4, 100 * 1024 * 1024))

    cost = pl.CostEstimate(
        flops=2 * bp * S * E * D + 2 * bp * S * D + 2 * bp * S * E,
        transcendentals=bp * S * (D + 1),                    # tanh + exp
        bytes_accessed=itemsize * (bp * S * E + E * D)
        + 4 * (D + bp * E + bp * S),
    )

    # NOTE: the weight specs are grid-invariant; Pallas skips re-fetching them.
    # (Single-buffering them via pipeline_mode=pl.Buffered(1) would save a
    # further E*D*itemsize of VMEM if needed on v7x.)
    out_sum, scores = pl.pallas_call(
        attention_kernel,
        out_shape=(
            jax.ShapeDtypeStruct((bp, E), jnp.float32),
            jax.ShapeDtypeStruct((bp, S, 1), jnp.float32),   # PyTorch scores layout
        ),
        grid_spec=pltpu.PrefetchScalarGridSpec(
            num_scalar_prefetch=0,
            grid=grid,
            in_specs=[
                pl.BlockSpec((bb, S, E), lambda i: (i, 0, 0)),
                pl.BlockSpec((E, D), lambda i: (0, 0)),
                pl.BlockSpec((1, D), lambda i: (0, 0)),
            ],
            out_specs=[
                pl.BlockSpec((bb, E), lambda i: (i, 0)),
                pl.BlockSpec((bb, S, 1), lambda i: (i, 0, 0)),
            ],
        ),
        compiler_params=pltpu.CompilerParams(
            dimension_semantics=("parallel",),               # shard batch grid across TCs
            vmem_limit_bytes=vmem_limit,
        ),
        cost_estimate=cost,
    )(enc_in, w_t, v_row)

    return out_sum[:B], scores[:B]


def reference_forward(enc_output, attn_w, v_w):
    energy = jnp.tanh(jnp.einsum("bse,de->bsd", enc_output, attn_w))
    att = jnp.einsum("bsd,od->bso", energy, v_w)             # (B, S, 1)
    scores = jax.nn.softmax(att, axis=1)
    out = enc_output * scores
    return jnp.sum(out, axis=1), scores


if __name__ == "__main__":
    key = jax.random.PRNGKey(0)
    B, S = 2, 8
    enc_hid_dim, dec_hid_dim = 32, 32

    k1, k2, k3 = jax.random.split(key, 3)
    enc_output = jax.random.normal(k1, (B, S, enc_hid_dim), dtype=jnp.float32)
    # nn.Linear(enc_hid_dim, dec_hid_dim, bias=False) -> weight (dec_hid_dim, enc_hid_dim)
    attn_w = jax.random.normal(k2, (dec_hid_dim, enc_hid_dim), dtype=jnp.float32) * 0.1
    # nn.Linear(dec_hid_dim, 1, bias=False) -> weight (1, dec_hid_dim)
    v_w = jax.random.normal(k3, (1, dec_hid_dim), dtype=jnp.float32) * 0.1

    # f32 path: exact parity with the reference.
    out_sum, scores = attention_forward(enc_output, attn_w, v_w)
    out_sum = jax.block_until_ready(out_sum)
    scores = jax.block_until_ready(scores)

    ref_sum, ref_scores = reference_forward(enc_output, attn_w, v_w)
    assert out_sum.shape == (B, enc_hid_dim)
    assert scores.shape == (B, S, 1)
    assert jnp.allclose(out_sum, ref_sum, atol=1e-5, rtol=1e-5)
    assert jnp.allclose(scores, ref_scores, atol=1e-5, rtol=1e-5)

    # bf16 input path (recommended on v6e/v7x, also a win on bandwidth-starved
    # v5e): halves the dominant HBM stream; accumulation/tanh/softmax stay f32.
    out_bf16, scores_bf16 = attention_forward(
        enc_output, attn_w, v_w, input_dtype=jnp.bfloat16)
    out_bf16 = jax.block_until_ready(out_bf16)
    scores_bf16 = jax.block_until_ready(scores_bf16)
    assert jnp.allclose(out_bf16, ref_sum, atol=5e-2, rtol=5e-2)
    assert jnp.allclose(scores_bf16, ref_scores, atol=5e-2, rtol=5e-2)

    print("KERNEL_OK")
</pallas_src>

<mosaic_0001>
module attributes {stable_mosaic.version = 11 : i64} {
  func.func @attention_kernel(%arg0: i32, %arg1: memref<8x8x32xf32, #tpu.memory_space<vmem>>, %arg2: memref<32x32xf32, #tpu.memory_space<vmem>>, %arg3: memref<1x32xf32, #tpu.memory_space<vmem>>, %arg4: memref<8x32xf32, #tpu.memory_space<vmem>>, %arg5: memref<8x8x1xf32, #tpu.memory_space<vmem>>) attributes {dimension_semantics = [#tpu.dimension_semantics<parallel>], iteration_bounds = array<i64: 1>, scalar_prefetch = 0 : i64, scratch_operands = 0 : i64, tpu.core_type = #tpu.core_type<tc>, window_params = [{transform_indices = @transform_0, window_bounds = array<i64: 8, 8, 32>}, {pipeline_mode = #tpu.pipeline_mode<synchronous>, transform_indices = @transform_1, window_bounds = array<i64: 32, 32>}, {pipeline_mode = #tpu.pipeline_mode<synchronous>, transform_indices = @transform_2, window_bounds = array<i64: 1, 32>}, {transform_indices = @transform_3, window_bounds = array<i64: 8, 32>}, {transform_indices = @transform_4, window_bounds = array<i64: 8, 8, 1>}]} {
    %c0 = arith.constant 0 : index
    %c0_0 = arith.constant 0 : index
    %c0_1 = arith.constant 0 : index
    %0 = vector.load %arg1[%c0, %c0_0, %c0_1] : memref<8x8x32xf32, #tpu.memory_space<vmem>>, vector<8x8x32xf32>
    %1 = vector.shape_cast %0 : vector<8x8x32xf32> to vector<64x32xf32>
    %c0_2 = arith.constant 0 : index
    %c0_3 = arith.constant 0 : index
    %2 = vector.load %arg2[%c0_2, %c0_3] : memref<32x32xf32, #tpu.memory_space<vmem>>, vector<32x32xf32>
    %cst = arith.constant dense<0.000000e+00> : vector<64x32xf32>
    %3 = tpu.matmul %1, %2, %cst {dimension_numbers = #tpu.dot_dimension_numbers<[1], [0], [0], [1], [0, 0, 1, 1], [], []>} : vector<64x32xf32>, vector<32x32xf32>, vector<64x32xf32> -> vector<64x32xf32>
    %4 = math.tanh %3 : vector<64x32xf32>
    %c0_4 = arith.constant 0 : index
    %c0_5 = arith.constant 0 : index
    %5 = vector.load %arg3[%c0_4, %c0_5] : memref<1x32xf32, #tpu.memory_space<vmem>>, vector<1x32xf32>
    %6 = vector.broadcast %5 : vector<1x32xf32> to vector<64x32xf32>
    %7 = arith.mulf %4, %6 : vector<64x32xf32>
    %cst_6 = arith.constant dense<0.000000e+00> : vector<64xf32>
    %8 = vector.multi_reduction <add>, %7, %cst_6 [1] : vector<64x32xf32> to vector<64xf32>
    %9 = vector.shape_cast %8 : vector<64xf32> to vector<64x1xf32>
    %10 = vector.shape_cast %9 : vector<64x1xf32> to vector<8x8x1xf32>
    %cst_7 = arith.constant dense<0xFF800000> : vector<8x1xf32>
    %11 = vector.multi_reduction <maximumf>, %10, %cst_7 [1] : vector<8x8x1xf32> to vector<8x1xf32>
    %12 = vector.shape_cast %11 : vector<8x1xf32> to vector<8x1x1xf32>
    %13 = vector.broadcast %12 : vector<8x1x1xf32> to vector<8x8x1xf32>
    %14 = arith.subf %10, %13 : vector<8x8x1xf32>
    %15 = math.exp %14 : vector<8x8x1xf32>
    %cst_8 = arith.constant dense<0.000000e+00> : vector<8x1xf32>
    %16 = vector.multi_reduction <add>, %15, %cst_8 [1] : vector<8x8x1xf32> to vector<8x1xf32>
    %17 = vector.shape_cast %16 : vector<8x1xf32> to vector<8x1x1xf32>
    %18 = tpu.reciprocal %17 : vector<8x1x1xf32> -> vector<8x1x1xf32>
    %19 = vector.broadcast %18 : vector<8x1x1xf32> to vector<8x8x1xf32>
    %20 = arith.mulf %15, %19 : vector<8x8x1xf32>
    %c0_9 = arith.constant 0 : index
    %c0_10 = arith.constant 0 : index
    %c0_11 = arith.constant 0 : index
    %21 = vector.load %arg5[%c0_9, %c0_10, %c0_11] : memref<8x8x1xf32, #tpu.memory_space<vmem>>, vector<8x8x1xf32>
    tpu.vector_store %arg5[%c0_9, %c0_10, %c0_11], %20 {strides = array<i32>} : memref<8x8x1xf32, #tpu.memory_space<vmem>>, vector<8x8x1xf32>,
    %22 = vector.broadcast %20 : vector<8x8x1xf32> to vector<8x8x32xf32>
    %23 = arith.mulf %0, %22 : vector<8x8x32xf32>
    %cst_12 = arith.constant dense<0.000000e+00> : vector<8x32xf32>
    %24 = vector.multi_reduction <add>, %23, %cst_12 [1] : vector<8x8x32xf32> to vector<8x32xf32>
    %c0_13 = arith.constant 0 : index
    %c0_14 = arith.constant 0 : index
    %25 = vector.load %arg4[%c0_13, %c0_14] : memref<8x32xf32, #tpu.memory_space<vmem>>, vector<8x32xf32>
    tpu.vector_store %arg4[%c0_13, %c0_14], %24 {strides = array<i32>} : memref<8x32xf32, #tpu.memory_space<vmem>>, vector<8x32xf32>,
    return
  }
  func.func @transform_0(%arg0: i32) -> (i32, i32, i32) {
    %c0_i32 = arith.constant 0 : i32
    %c0_i32_0 = arith.constant 0 : i32
    %c0_i32_1 = arith.constant 0 : i32
    return %arg0, %c0_i32, %c0_i32_0 : i32, i32, i32
  }
  func.func @transform_1(%arg0: i32) -> (i32, i32) {
    %c0_i32 = arith.constant 0 : i32
    %c0_i32_0 = arith.constant 0 : i32
    %c0_i32_1 = arith.constant 0 : i32
    return %c0_i32, %c0_i32_0 : i32, i32
  }
  func.func @transform_2(%arg0: i32) -> (i32, i32) {
    %c0_i32 = arith.constant 0 : i32
    %c0_i32_0 = arith.constant 0 : i32
    %c0_i32_1 = arith.constant 0 : i32
    return %c0_i32, %c0_i32_0 : i32, i32
  }
  func.func @transform_3(%arg0: i32) -> (i32, i32) {
    %c0_i32 = arith.constant 0 : i32
    %c0_i32_0 = arith.constant 0 : i32
    return %arg0, %c0_i32 : i32, i32
  }
  func.func @transform_4(%arg0: i32) -> (i32, i32, i32) {
    %c0_i32 = arith.constant 0 : i32
    %c0_i32_0 = arith.constant 0 : i32
    %c0_i32_1 = arith.constant 0 : i32
    return %arg0, %c0_i32, %c0_i32_0 : i32, i32, i32
  }
}

</mosaic_0001>

<bundles_post_ra>
// kernel: tpu_custom_call.1
= control target key start
LH: loop header
LB: loop body
LE: loop exit
PB: predicated region body
PF: predicated region fallthrough
CT: control target
= control target key end

     0   :  { %10 = vsyncpa [#allocation3], 0  ;;  %s863_s0 = inlined_call_operand.hbm [shape: f32[8,8,32], index: 0, kind: input, shape index: {}]   ;;  %s864_s1 = inlined_call_operand.hbm [shape: f32[32,32], index: 1, kind: input, shape index: {}]   ;;  %s865_s2 = inlined_call_operand.vmem [shape: f32[1,32], index: 2, kind: input, shape index: {}]   ;;  %s866_s3 = inlined_call_operand.hbm [shape: f32[8,32], index: 3, kind: output, shape index: {0}]   ;;  %s867_s4 = inlined_call_operand.vmem [shape: f32[8,8,1], index: 4, kind: output, shape index: {1}]  }
   0x1   :  { %11 = vsyncpa [#allocation6], 0 }
   0x2   :  { %12 = vsyncpa [#allocation4], 0  ;;  %s665_s15 = smov [#allocation2]   ;;  %s593_s19 = scalar_lea.hbm %s863_s0, 1024 }
   0x3   :  { %s18_s16 = sshll.u32 %s665_s15, 4  ;;  %p594_p0 = scmp.ne.s32.totalorder %s863_s0, %s593_s19  ;;  %s19_s16 = int_to_ptr.vmem [resolvable:$true] %s18_s16 }
   0x4   :  { %p597_p1 = scmp.lt.u32.totalorder %s593_s19, %s863_s0 }
   0x6   :  { %p599_p2 = pnand %p597_p1, %p594_p0 }
   0x8   :  { %602 = shalt.err (!%p599_p2)
}
   0x9   :  { %s603_s24 = scalar_lea.vmem %s19_s16, 1024  ;;  %p608_p4 = scmp.lt.s32.totalorder %s19_s16, %s19_s16 }
   0xa   :  { %p604_p3 = scmp.ne.s32.totalorder %s19_s16, %s603_s24  ;;  %p609_p5 = scmp.lt.s32.totalorder %s603_s24, %s603_s24 }
   0xc   :  { %p610_p6 = por %p609_p5, %p608_p4 }
   0xe   :  { %p611_p7 = pnand %p610_p6, %p604_p3 }
  0x10   :  { %614 = shalt.err (!%p611_p7)
}
  0x11   :  { %s666_s25 = smov 128   ;;  %s667_s26 = smov 8  }
  0x12   :  { %24 = dma.hbm_to_vmem [thread:$0]  %s863_s0, 1024, %s19_s16, [#allocation3], %s666_s25, %s666_s25, %s667_s26  }
  0x13   :  { %s668_s29 = smov [#allocation5]   ;;  %s615_s7 = scalar_lea.hbm %s864_s1, 512 }
  0x14   :  { %s30_s30 = sshll.u32 %s668_s29, 4  ;;  %p616_p8 = scmp.ne.s32.totalorder %s864_s1, %s615_s7  ;;  %s31_s30 = int_to_ptr.vmem [resolvable:$true] %s30_s30 }
  0x15   :  { %p619_p9 = scmp.lt.u32.totalorder %s615_s7, %s864_s1 }
  0x17   :  { %p621_p10 = pnand %p619_p9, %p616_p8 }
  0x19   :  { %624 = shalt.err (!%p621_p10)
}
  0x1a   :  { %s625_s12 = scalar_lea.vmem %s31_s30, 512  ;;  %p630_p12 = scmp.lt.s32.totalorder %s31_s30, %s31_s30 }
  0x1b   :  { %p626_p11 = scmp.ne.s32.totalorder %s31_s30, %s625_s12  ;;  %p631_p13 = scmp.lt.s32.totalorder %s625_s12, %s625_s12 }
  0x1d   :  { %p632_p0 = por %p631_p13, %p630_p12 }
  0x1f   :  { %p633_p1 = pnand %p632_p0, %p626_p11 }
  0x21   :  { %636 = shalt.err (!%p633_p1)
}
  0x22   :  { %36 = dma.hbm_to_vmem [thread:$0]  %s864_s1, 512, %s31_s30, [#allocation6], %s666_s25, %s666_s25, %s667_s26  }
  0x23   :  { %659 = dma.done.wait [#allocation3], 1024  }
  0x24   :  { %660 = vsyncadd [#allocation3], 4294966272 }
  0x25   :  { %661 = dma.done.wait [#allocation6], 512  }
  0x26   :  { %662 = vsyncadd [#allocation6], 4294966784  ;;  %vm57_vm0 = vcmask 261120   ;;  %v53_v0 = vld [vmem:[#allocation5] sm:$0xff]  ;;  %v54_v1 = vld [vmem:[#allocation5 + $0x8] sm:$0xff]  ;;  %vm370_vm1 = vcmask 7168  }
  0x27   :  { %v55_v2 = vld [vmem:[#allocation5 + $0x10] sm:$0xff]  ;;  %v528_v3 = vpack.c.bf16 %v54_v1, %v53_v0  ;;  %v56_v4 = vld [vmem:[#allocation5 + $0x18] sm:$0xff]  ;;  %v719_v5 = vld [vmem:[#allocation2] sm:$0xff]  ;;  %vm451_vm2 = vcmask 1041409   ;;  %vm453_vm3 = vcmask 1042434   ;;  %vm455_vm4 = vcmask 1043459  }
  0x28   :  { %v532_v6 = vpack.c.bf16 %v56_v4, %v55_v2  ;;  %516 = vmatprep.mubr.msk.f32.mxu0 %vm57_vm0, %v719_v5  ;;  %v723_v7 = vld [vmem:[#allocation2 + $0x20] sm:$0xff]  ;;  %v727_v8 = vld [vmem:[#allocation2 + $0x8] sm:$0xff]  ;;  %v731_v10 = vld [vmem:[#allocation2 + $0x10] sm:$0xff]  ;;  %vm457_vm5 = vcmask 1044484   ;;  %vm459_vm6 = vcmask 1045509   ;;  %vm461_vm7 = vcmask 1046534  }
  0x29   :  { %529 = vmatprep.subr.bf16.mxu0 %v528_v3  ;;  %536 = vmatprep.subr.bf16.mxu1 %v528_v3  ;;  %v729_v9 = vld [vmem:[#allocation2 + $0x28] sm:$0xff]  ;;  %v733_v11 = vld [vmem:[#allocation2 + $0x30] sm:$0xff]  ;;  %v741_v12 = vld [vmem:[#allocation2 + $0x18] sm:$0xff]  ;;  %vm463_vm8 = vcmask 1047559  }
  0x2a   :  { %531 = vmatpush3.bf16.msra.mxu0 %v528_v3  ;;  %538 = vmatpush3.bf16.msra.mxu1 %v528_v3  ;;  %v745_v13 = vld [vmem:[#allocation2 + $0x38] sm:$0xff]  ;;  %v495_v22 = vld [vmem:[%s865_s2] ss:$0 sm:$0xff] }
  0x2b   :  { %533 = vmatprep.subr.bf16.mxu0 %v532_v6  ;;  %537 = vmatprep.subr.bf16.mxu1 %v532_v6 }
  0x2c   :  { %522 = vmatprep.mubr.msk.f32.mxu1 %vm57_vm0, %v723_v7 }
  0x2e   :  { %535 = vmatpush3.bf16.msra.mxu0 %v532_v6  ;;  %539 = vmatpush3.bf16.msra.mxu1 %v532_v6 }
  0x31   :  { %517 = vmatmul.mubr.msk.f32.vlgmr.msra.gmra.mrb[0].mxu0 %vm57_vm0, %v727_v8  ;;  %523 = vmatmul.mubr.msk.f32.vlgmr.msra.gmra.mrb[0].mxu1 %vm57_vm0, %v729_v9 }
  0x32   :  { %519 = vmatprep.mubr.msk.f32.mxu0 %vm57_vm0, %v731_v10  ;;  %525 = vmatprep.mubr.msk.f32.mxu1 %vm57_vm0, %v733_v11 }
  0x35   :  { %520 = vmatmul.mubr.msk.f32.gmra.mrb[2].mxu0 %vm57_vm0, %v741_v12  ;;  %526 = vmatmul.mubr.msk.f32.gmra.mrb[2].mxu1 %vm57_vm0, %v745_v13 }
 0x104   :  { %v518_v14 = vpop.f32.mrb[0].mxu0  ;;  %v524_v15 = vpop.f32.mrb[0].mxu1 }
 0x105   :  { %545 = vtanh.f32 %v518_v14  ;;  %v148_v16 = vpop.f32.mrb[1].mxu0  ;;  %v168_v17 = vpop.f32.mrb[1].mxu1 }
 0x106   :  { %547 = vtanh.f32 %v148_v16 }
 0x107   :  { %549 = vtanh.f32 %v168_v17 }
 0x108   :  { %v521_v18 = vpop.f32.mrb[2].mxu0  ;;  %v527_v19 = vpop.f32.mrb[2].mxu1 }
 0x109   :  { %551 = vtanh.f32 %v521_v18  ;;  %v158_v20 = vpop.f32.mrb[3].mxu0  ;;  %v178_v21 = vpop.f32.mrb[3].mxu1 }
 0x10a   :  { %553 = vtanh.f32 %v158_v20 }
 0x10b   :  { %555 = vtanh.f32 %v178_v21 }
 0x10c   :  { %557 = vtanh.f32 %v524_v15 }
 0x10d   :  { %559 = vtanh.f32 %v527_v19 }
 0x10f   :  { %v546_v23 = vpop.eup %545 }
 0x110   :  { %v548_v24 = vpop.eup %547  ;;  %v203_v25 = vmul.f32 %v546_v23, %v495_v22 }
 0x111   :  { %v550_v26 = vpop.eup %549  ;;  %v202_v28 = vmul.f32 %v548_v24, %v495_v22 }
 0x112   :  { %v213_v27 = vsel %vm57_vm0, %v203_v25, 0.0  ;;  %v206_v32 = vmul.f32 %v550_v26, %v495_v22 }
 0x113   :  { %v552_v29 = vpop.eup %551  ;;  %214 = vadd.xlane.f32.xlu0 %v213_v27  ;;  %v210_v34 = vsel %vm57_vm0, %v202_v28, 0.0 }
 0x114   :  { %v554_v30 = vpop.eup %553  ;;  %v205_v31 = vmul.f32 %v552_v29, %v495_v22  ;;  %v222_v38 = vsel %vm57_vm0, %v206_v32, 0.0 }
 0x115   :  { %v556_v33 = vpop.eup %555  ;;  %v204_v36 = vmul.f32 %v554_v30, %v495_v22 }
 0x116   :  { %v219_v35 = vsel %vm57_vm0, %v205_v31, 0.0  ;;  %v558_v37 = vpop.eup %557  ;;  %v208_v39 = vmul.f32 %v556_v33, %v495_v22 }
 0x117   :  { %211 = vadd.xlane.f32.xlu0 %v210_v34  ;;  %220 = vadd.xlane.f32.xlu1 %v219_v35  ;;  %v216_v40 = vsel %vm57_vm0, %v204_v36, 0.0  ;;  %v207_v41 = vmul.f32 %v558_v37, %v495_v22  ;;  %v560_v42 = vpop.eup %559 }
 0x118   :  { %v228_v43 = vsel %vm57_vm0, %v208_v39, 0.0  ;;  %v209_v45 = vmul.f32 %v560_v42, %v495_v22 }
 0x119   :  { %v225_v44 = vsel %vm57_vm0, %v207_v41, 0.0 }
 0x11a   :  { %v231_v46 = vsel %vm57_vm0, %v209_v45, 0.0 }
 0x11b   :  { %223 = vadd.xlane.f32.xlu0 %v222_v38  ;;  %217 = vadd.xlane.f32.xlu1 %v216_v40 }
 0x11f   :  { %229 = vadd.xlane.f32.xlu0 %v228_v43  ;;  %226 = vadd.xlane.f32.xlu1 %v225_v44 }
 0x123   :  { %232 = vadd.xlane.f32.xlu1 %v231_v46 }
 0x1a0   :  { %v215_v47 = vpop.xlane.xlu0 %214 }
 0x1a1   :  { %v240_v48 = vrot.slane %v215_v47, 4 }
 0x1a3   :  { %v241_v49 = vmax.f32 %v215_v47, %v240_v48 }
 0x1a4   :  { %v212_v50 = vpop.xlane.xlu0 %211  ;;  %v221_v51 = vpop.xlane.xlu1 %220 }
 0x1a5   :  { %v242_v52 = vrot.slane %v241_v49, 2  ;;  %v234_v53 = vrot.slane %v212_v50, 4  ;;  %v252_v54 = vrot.slane %v221_v51, 4 }
 0x1a7   :  { %v243_v55 = vmax.f32 %v241_v49, %v242_v52  ;;  %v235_v56 = vmax.f32 %v212_v50, %v234_v53  ;;  %v253_v57 = vmax.f32 %v221_v51, %v252_v54 }
 0x1a8   :  { %v224_v58 = vpop.xlane.xlu0 %223  ;;  %v218_v59 = vpop.xlane.xlu1 %217 }
 0x1a9   :  { %v244_v60 = vrot.slane %v243_v55, 1  ;;  %v236_v61 = vrot.slane %v235_v56, 2  ;;  %v254_v62 = vrot.slane %v253_v57, 2  ;;  %v258_v63 = vrot.slane %v224_v58, 4 }
 0x1aa   :  { %v246_v0 = vrot.slane %v218_v59, 4 }
 0x1ab   :  { %v245_v1 = vmax.f32 %v243_v55, %v244_v60  ;;  %v237_v2 = vmax.f32 %v235_v56, %v236_v61  ;;  %v255_v3 = vmax.f32 %v253_v57, %v254_v62  ;;  %v259_v4 = vmax.f32 %v224_v58, %v258_v63 }
 0x1ac   :  { %v247_v6 = vmax.f32 %v218_v59, %v246_v0  ;;  %v230_v14 = vpop.xlane.xlu0 %229  ;;  %v227_v15 = vpop.xlane.xlu1 %226 }
 0x1ad   :  { %v283_v16 = vsub.f32 %v215_v47, %v245_v1  ;;  %v238_v17 = vrot.slane %v237_v2, 1  ;;  %v256_v18 = vrot.slane %v255_v3, 1  ;;  %v260_v19 = vrot.slane %v259_v4, 2 }
 0x1ae   :  { %v248_v20 = vrot.slane %v247_v6, 2  ;;  %v270_v21 = vrot.slane %v230_v14, 4  ;;  %v264_v22 = vrot.slane %v227_v15, 4 }
 0x1af   :  { %v292_v23 = vmul.f32 1.442695, %v283_v16  ;;  %v239_v24 = vmax.f32 %v237_v2, %v238_v17  ;;  %v257_v25 = vmax.f32 %v255_v3, %v256_v18  ;;  %v261_v26 = vmax.f32 %v259_v4, %v260_v19 }
 0x1b0   :  { %v249_v27 = vmax.f32 %v247_v6, %v248_v20  ;;  %v271_v28 = vmax.f32 %v230_v14, %v270_v21  ;;  %v265_v29 = vmax.f32 %v227_v15, %v264_v22  ;;  %v233_v30 = vpop.xlane.xlu1 %232 }
 0x1b1   :  { %561 = vpow2.f32 %v292_v23  ;;  %v282_v31 = vsub.f32 %v212_v50, %v239_v24  ;;  %v285_v32 = vsub.f32 %v221_v51, %v257_v25  ;;  %v262_v33 = vrot.slane %v261_v26, 1 }
 0x1b2   :  { %v250_v34 = vrot.slane %v249_v27, 1  ;;  %v272_v35 = vrot.slane %v271_v28, 2  ;;  %v266_v36 = vrot.slane %v265_v29, 2  ;;  %v276_v37 = vrot.slane %v233_v30, 4 }
 0x1b3   :  { %v290_v38 = vmul.f32 1.442695, %v282_v31  ;;  %v296_v39 = vmul.f32 1.442695, %v285_v32  ;;  %v263_v40 = vmax.f32 %v261_v26, %v262_v33 }
 0x1b4   :  { %v251_v41 = vmax.f32 %v249_v27, %v250_v34  ;;  %v273_v42 = vmax.f32 %v271_v28, %v272_v35  ;;  %v267_v43 = vmax.f32 %v265_v29, %v266_v36  ;;  %v277_v44 = vmax.f32 %v233_v30, %v276_v37 }
 0x1b5   :  { %563 = vpow2.f32 %v290_v38  ;;  %v286_v45 = vsub.f32 %v224_v58, %v263_v40 }
 0x1b6   :  { %565 = vpow2.f32 %v296_v39  ;;  %v284_v46 = vsub.f32 %v218_v59, %v251_v41  ;;  %v274_v47 = vrot.slane %v273_v42, 1  ;;  %v268_v48 = vrot.slane %v267_v43, 1 }
 0x1b7   :  { %v298_v49 = vmul.f32 1.442695, %v286_v45  ;;  %v278_v50 = vrot.slane %v277_v44, 2 }
 0x1b8   :  { %v294_v51 = vmul.f32 1.442695, %v284_v46  ;;  %v275_v52 = vmax.f32 %v273_v42, %v274_v47  ;;  %v269_v53 = vmax.f32 %v267_v43, %v268_v48 }
 0x1b9   :  { %567 = vpow2.f32 %v298_v49  ;;  %v279_v54 = vmax.f32 %v277_v44, %v278_v50 }
 0x1ba   :  { %569 = vpow2.f32 %v294_v51  ;;  %v288_v55 = vsub.f32 %v230_v14, %v275_v52  ;;  %v287_v56 = vsub.f32 %v227_v15, %v269_v53 }
 0x1bb   :  { %v762_v57 = vpop.eup %561  ;;  %v280_v60 = vrot.slane %v279_v54, 1 }
 0x1bc   :  { %v312_v61 = vrot.slane %v762_v57, 4  ;;  %v302_v58 = vmul.f32 1.442695, %v288_v55  ;;  %v300_v62 = vmul.f32 1.442695, %v287_v56 }
 0x1bd   :  { %v281_v59 = vmax.f32 %v279_v54, %v280_v60 }
 0x1be   :  { %v313_v63 = vadd.f32 %v762_v57, %v312_v61  ;;  %571 = vpow2.f32 %v302_v58 }
 0x1bf   :  { %v766_v0 = vpop.eup %563  ;;  %573 = vpow2.f32 %v300_v62  ;;  %v289_v1 = vsub.f32 %v233_v30, %v281_v59 }
 0x1c0   :  { %v768_v2 = vpop.eup %565  ;;  %v314_v3 = vrot.slane %v313_v63, 2  ;;  %v306_v4 = vrot.slane %v766_v0, 4 }
 0x1c1   :  { %v324_v6 = vrot.slane %v768_v2, 4  ;;  %v304_v14 = vmul.f32 1.442695, %v289_v1 }
 0x1c2   :  { %v315_v15 = vadd.f32 %v314_v3, %v313_v63  ;;  %v307_v16 = vadd.f32 %v766_v0, %v306_v4 }
 0x1c3   :  { %v773_v17 = vpop.eup %567  ;;  %v325_v18 = vadd.f32 %v768_v2, %v324_v6  ;;  %575 = vpow2.f32 %v304_v14 }
 0x1c4   :  { %v776_v19 = vpop.eup %569  ;;  %v316_v20 = vrot.slane %v315_v15, 1  ;;  %v308_v21 = vrot.slane %v307_v16, 2  ;;  %v330_v22 = vrot.slane %v773_v17, 4 }
 0x1c5   :  { %v326_v23 = vrot.slane %v325_v18, 2  ;;  %v318_v24 = vrot.slane %v776_v19, 4 }
 0x1c6   :  { %v317_v25 = vadd.f32 %v316_v20, %v315_v15  ;;  %v309_v26 = vadd.f32 %v308_v21, %v307_v16  ;;  %v331_v27 = vadd.f32 %v773_v17, %v330_v22 }
 0x1c7   :  { %v327_v28 = vadd.f32 %v326_v23, %v325_v18  ;;  %v319_v29 = vadd.f32 %v776_v19, %v318_v24 }
 0x1c8   :  { %v782_v30 = vpop.eup %571  ;;  %577 = vrcp.f32 %v317_v25  ;;  %v310_v31 = vrot.slane %v309_v26, 1  ;;  %v332_v32 = vrot.slane %v331_v27, 2 }
 0x1c9   :  { %v784_v33 = vpop.eup %573  ;;  %v328_v34 = vrot.slane %v327_v28, 1  ;;  %v320_v35 = vrot.slane %v319_v29, 2  ;;  %v342_v36 = vrot.slane %v782_v30, 4 }
 0x1ca   :  { %v311_v37 = vadd.f32 %v310_v31, %v309_v26  ;;  %v333_v38 = vadd.f32 %v332_v32, %v331_v27  ;;  %v336_v39 = vrot.slane %v784_v33, 4 }
 0x1cb   :  { %v329_v40 = vadd.f32 %v328_v34, %v327_v28  ;;  %v321_v41 = vadd.f32 %v320_v35, %v319_v29  ;;  %v343_v42 = vadd.f32 %v782_v30, %v342_v36 }
 0x1cc   :  { %579 = vrcp.f32 %v311_v37  ;;  %v334_v43 = vrot.slane %v333_v38, 1  ;;  %v337_v44 = vadd.f32 %v784_v33, %v336_v39 }
 0x1cd   :  { %v790_v45 = vpop.eup %575  ;;  %581 = vrcp.f32 %v329_v40  ;;  %v322_v46 = vrot.slane %v321_v41, 1  ;;  %v344_v47 = vrot.slane %v343_v42, 2 }
 0x1ce   :  { %v335_v48 = vadd.f32 %v334_v43, %v333_v38  ;;  %v338_v49 = vrot.slane %v337_v44, 2  ;;  %v348_v50 = vrot.slane %v790_v45, 4 }
 0x1cf   :  { %v323_v51 = vadd.f32 %v322_v46, %v321_v41  ;;  %v345_v52 = vadd.f32 %v344_v47, %v343_v42 }
 0x1d0   :  { %583 = vrcp.f32 %v335_v48  ;;  %v339_v53 = vadd.f32 %v338_v49, %v337_v44  ;;  %v349_v54 = vadd.f32 %v790_v45, %v348_v50 }
 0x1d1   :  { %585 = vrcp.f32 %v323_v51  ;;  %v346_v55 = vrot.slane %v345_v52, 1 }
 0x1d2   :  { %v578_v56 = vpop.eup %577  ;;  %v340_v60 = vrot.slane %v339_v53, 1  ;;  %v350_v61 = vrot.slane %v349_v54, 2 }
 0x1d3   :  { %v363_v58 = vmul.f32 %v578_v56, %v762_v57  ;;  %v347_v62 = vadd.f32 %v346_v55, %v345_v52 }
 0x1d4   :  { %v341_v59 = vadd.f32 %v340_v60, %v339_v53  ;;  %v351_v63 = vadd.f32 %v350_v61, %v349_v54 }
 0x1d5   :  { %372 = vst.msk [vmem:[%s867_s4 + $0x8] sm:$0xff] %vm370_vm1, %v363_v58  ;;  %587 = vrcp.f32 %v347_v62  ;;  %v380_v1 = vmul.f32 %v363_v58, %v727_v8 }
 0x1d6   :  { %v580_v3 = vpop.eup %579  ;;  %v352_v4 = vrot.slane %v351_v63, 1  ;;  %589 = vrcp.f32 %v341_v59 }
 0x1d7   :  { %v582_v6 = vpop.eup %581  ;;  %v362_v14 = vmul.f32 %v580_v3, %v766_v0  ;;  %v394_v15 = vsel %vm57_vm0, %v380_v1, 0.0 }
 0x1d8   :  { %v353_v57 = vadd.f32 %v352_v4, %v351_v63  ;;  %v365_v16 = vmul.f32 %v582_v6, %v768_v2  ;;  %v395_v18 = vrot.slane %v394_v15, 4 }
 0x1d9   :  { %371 = vst.msk [vmem:[%s867_s4] sm:$0xff] %vm370_vm1, %v362_v14  ;;  %v379_v20 = vmul.f32 %v362_v14, %v719_v5 }
 0x1da   :  { %v584_v8 = vpop.eup %583  ;;  %591 = vrcp.f32 %v353_v57  ;;  %374 = vst.msk [vmem:[%s867_s4 + $0x18] sm:$0xff] %vm370_vm1, %v365_v16  ;;  %v382_v0 = vmul.f32 %v365_v16, %v741_v12  ;;  %v396_v21 = vadd.f32 %v395_v18, %v394_v15 }
 0x1db   :  { %v586_v22 = vpop.eup %585  ;;  %v366_v2 = vmul.f32 %v584_v8, %v773_v17  ;;  %v387_v23 = vsel %vm57_vm0, %v379_v20, 0.0 }
 0x1dc   :  { %v364_v24 = vmul.f32 %v586_v22, %v776_v19  ;;  %v388_v25 = vrot.slane %v387_v23, 4  ;;  %v408_v5 = vsel %vm57_vm0, %v382_v0, 0.0  ;;  %v397_v19 = vrot.slane %v396_v21, 2 }
 0x1dd   :  { %375 = vst.msk [vmem:[%s867_s4 + $0x20] sm:$0xff] %vm370_vm1, %v366_v2  ;;  %v383_v26 = vmul.f32 %v366_v2, %v723_v7  ;;  %v409_v27 = vrot.slane %v408_v5, 4 }
 0x1de   :  { %373 = vst.msk [vmem:[%s867_s4 + $0x10] sm:$0xff] %vm370_vm1, %v364_v24  ;;  %v381_v12 = vmul.f32 %v364_v24, %v731_v10  ;;  %v389_v17 = vadd.f32 %v388_v25, %v387_v23  ;;  %v398_v41 = vadd.f32 %v397_v19, %v396_v21 }
 0x1df   :  { %v588_v28 = vpop.eup %587  ;;  %v410_v29 = vadd.f32 %v409_v27, %v408_v5  ;;  %v415_v31 = vsel %vm57_vm0, %v383_v26, 0.0 }
 0x1e0   :  { %v590_v32 = vpop.eup %589  ;;  %v368_v34 = vmul.f32 %v588_v28, %v782_v30  ;;  %v390_v35 = vrot.slane %v389_v17, 2  ;;  %v401_v7 = vsel %vm57_vm0, %v381_v12, 0.0  ;;  %v416_v39 = vrot.slane %v415_v31, 4 }
 0x1e1   :  { %v367_v36 = vmul.f32 %v590_v32, %v784_v33  ;;  %v402_v37 = vrot.slane %v401_v7, 4  ;;  %v411_v38 = vrot.slane %v410_v29, 2  ;;  %v399_v50 = vrot.slane %v398_v41, 1 }
 0x1e2   :  { %377 = vst.msk [vmem:[%s867_s4 + $0x30] sm:$0xff] %vm370_vm1, %v368_v34  ;;  %v385_v10 = vmul.f32 %v368_v34, %v733_v11  ;;  %v391_v40 = vadd.f32 %v390_v35, %v389_v17  ;;  %v417_v43 = vadd.f32 %v416_v39, %v415_v31 }
 0x1e3   :  { %376 = vst.msk [vmem:[%s867_s4 + $0x28] sm:$0xff] %vm370_vm1, %v367_v36  ;;  %v384_v30 = vmul.f32 %v367_v36, %v729_v9  ;;  %v403_v33 = vadd.f32 %v402_v37, %v401_v7  ;;  %v412_v42 = vadd.f32 %v411_v38, %v410_v29  ;;  %v400_v62 = vadd.f32 %v399_v50, %v398_v41 }
 0x1e4   :  { %v592_v44 = vpop.eup %591  ;;  %v392_v46 = vrot.slane %v391_v40, 1  ;;  %v429_v47 = vsel %vm57_vm0, %v385_v10, 0.0  ;;  %v418_v11 = vrot.slane %v417_v43, 2 }
 0x1e5   :  { %v369_v48 = vmul.f32 %v592_v44, %v790_v45  ;;  %v404_v49 = vrot.slane %v403_v33, 2  ;;  %v422_v51 = vsel %vm57_vm0, %v384_v30, 0.0  ;;  %v430_v52 = vrot.slane %v429_v47, 4 }
 0x1e6   :  { %v413_v54 = vrot.slane %v412_v42, 1  ;;  %v419_v55 = vadd.f32 %v418_v11, %v417_v43  ;;  %v393_v56 = vadd.f32 %v392_v46, %v391_v40  ;;  %v423_v60 = vrot.slane %v422_v51, 4 }
 0x1e7   :  { %378 = vst.msk [vmem:[%s867_s4 + $0x38] sm:$0xff] %vm370_vm1, %v369_v48  ;;  %v386_v9 = vmul.f32 %v369_v48, %v745_v13  ;;  %v405_v53 = vadd.f32 %v404_v49, %v403_v33  ;;  %v431_v61 = vadd.f32 %v430_v52, %v429_v47  ;;  %s669_s4 = smov [#allocation7]  }
 0x1e8   :  { %v424_v59 = vadd.f32 %v423_v60, %v422_v51  ;;  %v414_v4 = vadd.f32 %v413_v54, %v412_v42  ;;  %v420_v6 = vrot.slane %v419_v55, 1  ;;  %v452_v57 = vsel %vm451_vm2, %v400_v62, %v393_v56  ;;  %s473_s30 = sshll.u32 %s669_s4, 4  ;;  %s474_s30 = int_to_ptr.vmem [resolvable:$true] %s473_s30 }
 0x1e9   :  { %v406_v45 = vrot.slane %v405_v53, 1  ;;  %v436_v58 = vsel %vm57_vm0, %v386_v9, 0.0  ;;  %v432_v63 = vrot.slane %v431_v61, 2  ;;  %s637_s5 = scalar_lea.vmem %s474_s30, 128  ;;  %p642_p3 = scmp.lt.s32.totalorder %s474_s30, %s474_s30 }
 0x1ea   :  { %v437_v1 = vrot.slane %v436_v58, 4  ;;  %v425_v13 = vrot.slane %v424_v59, 2  ;;  %v421_v21 = vadd.f32 %v420_v6, %v419_v55  ;;  %p638_p2 = scmp.ne.s32.totalorder %s474_s30, %s637_s5  ;;  %p643_p4 = scmp.lt.s32.totalorder %s637_s5, %s637_s5 }
 0x1eb   :  { %v407_v3 = vadd.f32 %v406_v45, %v405_v53  ;;  %v433_v14 = vadd.f32 %v432_v63, %v431_v61 }
 0x1ec   :  { %v438_v15 = vadd.f32 %v437_v1, %v436_v58  ;;  %v426_v18 = vadd.f32 %v425_v13, %v424_v59  ;;  %p644_p5 = por %p643_p4, %p642_p3 }
 0x1ed   :  { %v454_v16 = vsel %vm453_vm3, %v407_v3, %v452_v57  ;;  %v434_v20 = vrot.slane %v433_v14, 1 }
 0x1ee   :  { %v439_v8 = vrot.slane %v438_v15, 2  ;;  %v456_v0 = vsel %vm455_vm4, %v414_v4, %v454_v16  ;;  %v427_v22 = vrot.slane %v426_v18, 1  ;;  %p645_p6 = pnand %p644_p5, %p638_p2 }
 0x1ef   :  { %v435_v23 = vadd.f32 %v434_v20, %v433_v14  ;;  %v458_v24 = vsel %vm457_vm5, %v421_v21, %v456_v0 }
 0x1f0   :  { %v440_v2 = vadd.f32 %v439_v8, %v438_v15  ;;  %v428_v25 = vadd.f32 %v427_v22, %v426_v18 }
 0x1f2   :  { %v441_v5 = vrot.slane %v440_v2, 1  ;;  %v460_v27 = vsel %vm459_vm6, %v428_v25, %v458_v24 }
 0x1f3   :  { %v462_v12 = vsel %vm461_vm7, %v435_v23, %v460_v27 }
 0x1f4   :  { %v442_v26 = vadd.f32 %v441_v5, %v440_v2 }
 0x1f6   :  { %v464_v17 = vsel %vm463_vm8, %v442_v26, %v462_v12 }
 0x1f7   :  { %466 = vst.msk [vmem:[#allocation7] sm:$0xff] %vm57_vm0, %v464_v17 }
 0x1f8   :  { %648 = shalt.err (!%p645_p6)
}
 0x1f9   :  { %s649_s8 = scalar_lea.hbm %s866_s3, 128 }
 0x1fa   :  { %p650_p7 = scmp.ne.s32.totalorder %s866_s3, %s649_s8  ;;  %p653_p8 = scmp.lt.u32.totalorder %s649_s8, %s866_s3 }
 0x1fc   :  { %p655_p9 = pnand %p653_p8, %p650_p7 }
 0x1fe   :  { %658 = shalt.err (!%p655_p9)
}
 0x1ff   :  { %476 = dma.vmem_to_hbm [thread:$0]  %s474_s30, 128, %s866_s3, [#allocation4]  }
 0x200   :  { %663 = dma.done.wait [#allocation4], 128  }
 0x201   :  { %664 = vsyncadd [#allocation4], 4294967168 }
 0x202   :  { %484 = vsyncpa [#allocation3], 1 }
 0x203   :  { %485 = vsyncpa [#allocation6], 1 }
 0x204   :  { %486 = vsyncpa [#allocation4], 1 }

</bundles_post_ra>
